<compile_context>
chip_gen: v6e
topology: v6e:2x2x1
jax: 0.10.0
libtpu: 0.0.40
codegen_flags: <defaults>
</compile_context>

<pallas_src>
import functools

import jax
import jax.numpy as jnp
from jax.experimental import pallas as pl
from jax.experimental.pallas import tpu as pltpu

HEAD_PAD = 128  # lane-dense padded width for the fused realness/class head


def _round_up(x, m):
    return (x + m - 1) // m * m


def discriminator_kernel(
    fp_ref, ft_ref,
    w_fp1, b_fp1, w_fp2, b_fp2,
    w_ft1, b_ft1, w_ft2, b_ft2,
    w_c, b_c,
    w_head, b_head,
    head_ref,
    *, fuse_combined,
):
    f32 = jnp.float32
    bf16 = jnp.bfloat16
    H = w_fp1.shape[1]

    # fingerprint branch: Linear -> ReLU -> (Dropout) -> Linear -> ReLU -> (Dropout)
    fp = fp_ref[...].astype(bf16)                                        # in-kernel cast
    h = jnp.maximum(jnp.dot(fp, w_fp1[...], preferred_element_type=f32) + b_fp1[...], 0.0)
    h = jnp.maximum(jnp.dot(h.astype(bf16), w_fp2[...], preferred_element_type=f32) + b_fp2[...], 0.0)

    # feature branch: Linear -> ReLU -> (Dropout) -> Linear -> ReLU -> (Dropout)
    ft = ft_ref[...].astype(bf16)                                        # in-kernel cast
    g = jnp.maximum(jnp.dot(ft, w_ft1[...], preferred_element_type=f32) + b_ft1[...], 0.0)
    g = jnp.maximum(jnp.dot(g.astype(bf16), w_ft2[...], preferred_element_type=f32) + b_ft2[...], 0.0)

    # combined branch: relu(cat(h, g) @ w_c + b_c)
    if fuse_combined:
        # v6e/v7x: single K=2H dot fully fills the 256-deep MXU
        hg = jnp.concatenate([h.astype(bf16), g.astype(bf16)], axis=1)   # (TB, 2H)
        c = jnp.dot(hg, w_c[...], preferred_element_type=f32) + b_c[...]
    else:
        # v5e (128-deep MXU): two K=H dots, concat eliminated
        c = (jnp.dot(h.astype(bf16), w_c[0:H, :], preferred_element_type=f32)
             + jnp.dot(g.astype(bf16), w_c[H:2 * H, :], preferred_element_type=f32)
             + b_c[...])
    c = jnp.maximum(c, 0.0)

    # fused heads: one lane-dense (TB, HEAD_PAD) matmul + unmasked bf16 store.
    # column 0 -> realness (sigmoid applied in-kernel), columns 1:3 -> class logits.
    out = jnp.dot(c.astype(bf16), w_head[...], preferred_element_type=f32) + b_head[...]
    col = jax.lax.broadcasted_iota(jnp.int32, out.shape, 1)
    out = jnp.where(col == 0, jax.nn.sigmoid(out), out)
    head_ref[...] = out.astype(head_ref.dtype)


def _prepare_kernel_params(params):
    """Reorganize PyTorch-style params for the kernel (bf16 weights, fused head)."""
    (w_fp1, b_fp1, w_fp2, b_fp2,
     w_ft1, b_ft1, w_ft2, b_ft2,
     w_c, b_c,
     w_real, b_real, w_cls, b_cls) = params

    H = w_fp1.shape[1]
    bf16 = jnp.bfloat16

    # pack the two heads into one padded [H, HEAD_PAD] weight / [1, HEAD_PAD] bias
    w_head = jnp.zeros((H, HEAD_PAD), jnp.float32)
    w_head = w_head.at[:, 0:1].set(w_real)
    w_head = w_head.at[:, 1:3].set(w_cls)
    b_head = jnp.zeros((1, HEAD_PAD), jnp.float32)
    b_head = b_head.at[:, 0:1].set(b_real)
    b_head = b_head.at[:, 1:3].set(b_cls)

    return (
        w_fp1.astype(bf16), b_fp1, w_fp2.astype(bf16), b_fp2,
        w_ft1.astype(bf16), b_ft1, w_ft2.astype(bf16), b_ft2,
        w_c.astype(bf16), b_c,
        w_head.astype(bf16), b_head,
    )


@functools.partial(jax.jit, static_argnames=("batch_tile", "fuse_combined"))
def _forward_impl(fingerprint, features, params, *, batch_tile, fuse_combined):
    B, fp_dim = fingerprint.shape
    ft_dim = features.shape[1]
    kparams = _prepare_kernel_params(params)
    H = kparams[0].shape[1]

    # batch tiling: TB multiple of 16 (bf16 sublane packing); no wrapper-side padding,
    # the last grid block is ragged and its extra rows are never consumed.
    TB = min(batch_tile, _round_up(B, 16))
    if TB >= B and B >= 32:
        # ensure >=2 grid steps so the "parallel" batch axis can shard across 2 TCs (v7x)
        TB = max(16, _round_up(pl.cdiv(B, 2), 16))
    grid = (pl.cdiv(B, TB),)

    # BlockSpecs: batch-tiled inputs/output (f32 in, bf16 out), resident weights/biases
    in_specs = [
        pl.BlockSpec((TB, fp_dim), lambda i: (i, 0)),
        pl.BlockSpec((TB, ft_dim), lambda i: (i, 0)),
    ] + [pl.BlockSpec(p.shape, lambda i: (0, 0)) for p in kparams]
    out_specs = pl.BlockSpec((TB, HEAD_PAD), lambda i: (i, 0))

    # advisory cost estimate (7 matmuls; sigmoid column counted as transcendentals)
    flops = 2 * B * (fp_dim * H + H * H + ft_dim * H + H * H + 2 * H * H + H * HEAD_PAD)
    weight_bytes = sum(int(p.size) * p.dtype.itemsize for p in kparams)
    bytes_accessed = B * (fp_dim + ft_dim) * 4 + B * HEAD_PAD * 2 + weight_bytes

    # VMEM budget: resident weights + double-buffered f32 input / bf16 output tiles
    # + live f32 intermediates (h, g, concat, c, head), with 1.5x headroom, capped 32 MiB.
    vmem_est = (weight_bytes
                + 2 * 4 * TB * (fp_dim + ft_dim)          # f32 input tiles, double-buffered
                + 2 * 2 * TB * HEAD_PAD                   # bf16 output tiles, double-buffered
                + 4 * TB * (6 * H + HEAD_PAD))            # f32/bf16 intermediates
    vmem_limit = min(32 * 1024 * 1024, max(8 * 1024 * 1024, int(1.5 * vmem_est)))

    head = pl.pallas_call(
        functools.partial(discriminator_kernel, fuse_combined=fuse_combined),
        grid=grid,
        in_specs=in_specs,
        out_specs=out_specs,
        out_shape=jax.ShapeDtypeStruct((B, HEAD_PAD), jnp.bfloat16),
        compiler_params=pltpu.CompilerParams(
            dimension_semantics=("parallel",),
            vmem_limit_bytes=int(vmem_limit),
        ),
        cost_estimate=pl.CostEstimate(
            flops=int(flops),
            transcendentals=int(B * HEAD_PAD),
            bytes_accessed=int(bytes_accessed),
        ),
    )(fingerprint, features, *kparams)

    realness = head[:, 0:1].astype(jnp.float32)          # sigmoid already applied in-kernel
    class_logits = head[:, 1:3].astype(jnp.float32)
    return {"realness": realness, "class_logits": class_logits}


def discriminator_forward(fingerprint, features, params, *, batch_tile=1024):
    # Gate the K=2H combined-layer fusion on MXU depth: fuse on v6e/v7x (256-deep MXU),
    # keep the split K=H form on v5e and older (128-deep MXU).
    kind = jax.devices()[0].device_kind.lower()
    fuse_combined = not any(tag in kind for tag in ("v2", "v3", "v4", "v5"))
    return _forward_impl(fingerprint, features, params,
                         batch_tile=batch_tile, fuse_combined=fuse_combined)


def init_params(key, fingerprint_dim, feature_dim, hidden_dim=128):
    """Deterministic parameter init (uniform, PyTorch-Linear-like fan-in scaling).

    Weights stored as [in_dim, out_dim] (transpose of PyTorch), biases as [1, out_dim].
    """
    def linear(k, in_dim, out_dim):
        kw, kb = jax.random.split(k)
        bound = 1.0 / (in_dim ** 0.5)
        w = jax.random.uniform(kw, (in_dim, out_dim), jnp.float32, -bound, bound)
        b = jax.random.uniform(kb, (1, out_dim), jnp.float32, -bound, bound)
        return w, b

    keys = jax.random.split(key, 7)
    w_fp1, b_fp1 = linear(keys[0], fingerprint_dim, hidden_dim)
    w_fp2, b_fp2 = linear(keys[1], hidden_dim, hidden_dim)
    w_ft1, b_ft1 = linear(keys[2], feature_dim, hidden_dim)
    w_ft2, b_ft2 = linear(keys[3], hidden_dim, hidden_dim)
    w_c, b_c = linear(keys[4], 2 * hidden_dim, hidden_dim)
    w_real, b_real = linear(keys[5], hidden_dim, 1)
    w_cls, b_cls = linear(keys[6], hidden_dim, 2)
    return (
        w_fp1, b_fp1, w_fp2, b_fp2,
        w_ft1, b_ft1, w_ft2, b_ft2,
        w_c, b_c,
        w_real, b_real, w_cls, b_cls,
    )


def _reference_forward(fingerprint, features, params):
    """Pure-JAX f32 reference (eval-mode dropout = identity)."""
    (w_fp1, b_fp1, w_fp2, b_fp2,
     w_ft1, b_ft1, w_ft2, b_ft2,
     w_c, b_c, w_real, b_real, w_cls, b_cls) = params
    relu = lambda x: jnp.maximum(x, 0.0)
    h = relu(fingerprint @ w_fp1 + b_fp1)
    h = relu(h @ w_fp2 + b_fp2)
    g = relu(features @ w_ft1 + b_ft1)
    g = relu(g @ w_ft2 + b_ft2)
    c = relu(jnp.concatenate([h, g], axis=1) @ w_c + b_c)
    return {
        "realness": jax.nn.sigmoid(c @ w_real + b_real),
        "class_logits": c @ w_cls + b_cls,
    }


if __name__ == "__main__":
    fingerprint_dim = 256   # Morgan fingerprint dim (small, synthetic)
    feature_dim = 16        # physico-chemical features (HOMO/LUMO/Gap etc., padded)
    hidden_dim = 128
    batch = 8

    key = jax.random.PRNGKey(0)
    k_fp, k_ft, k_params = jax.random.split(key, 3)

    fingerprint = (jax.random.uniform(k_fp, (batch, fingerprint_dim)) > 0.5).astype(jnp.float32)
    features = jax.random.normal(k_ft, (batch, feature_dim), jnp.float32)

    params = init_params(k_params, fingerprint_dim, feature_dim, hidden_dim)

    out = discriminator_forward(fingerprint, features, params)
    jax.block_until_ready(out)

    assert out["realness"].shape == (batch, 1)
    assert out["class_logits"].shape == (batch, 2)
    # sigmoid output range sanity check
    assert bool(jnp.all((out["realness"] >= 0.0) & (out["realness"] <= 1.0)))

    # numerical sanity vs. f32 reference (bf16 matmul operands + bf16 output -> loose tolerance)
    ref = _reference_forward(fingerprint, features, params)
    assert bool(jnp.all(jnp.abs(out["class_logits"] - ref["class_logits"]) < 0.1))
    assert bool(jnp.all(jnp.abs(out["realness"] - ref["realness"]) < 0.05))

    print("KERNEL_OK")
</pallas_src>

<mosaic_0001>
module attributes {stable_mosaic.version = 11 : i64} {
  func.func @discriminator_kernel(%arg0: i32, %arg1: memref<16x256xf32, #tpu.memory_space<vmem>>, %arg2: memref<16x16xf32, #tpu.memory_space<vmem>>, %arg3: memref<256x128xbf16, #tpu.memory_space<vmem>>, %arg4: memref<1x128xf32, #tpu.memory_space<vmem>>, %arg5: memref<128x128xbf16, #tpu.memory_space<vmem>>, %arg6: memref<1x128xf32, #tpu.memory_space<vmem>>, %arg7: memref<16x128xbf16, #tpu.memory_space<vmem>>, %arg8: memref<1x128xf32, #tpu.memory_space<vmem>>, %arg9: memref<128x128xbf16, #tpu.memory_space<vmem>>, %arg10: memref<1x128xf32, #tpu.memory_space<vmem>>, %arg11: memref<256x128xbf16, #tpu.memory_space<vmem>>, %arg12: memref<1x128xf32, #tpu.memory_space<vmem>>, %arg13: memref<128x128xbf16, #tpu.memory_space<vmem>>, %arg14: memref<1x128xf32, #tpu.memory_space<vmem>>, %arg15: memref<16x128xbf16, #tpu.memory_space<vmem>>) attributes {dimension_semantics = [#tpu.dimension_semantics<parallel>], iteration_bounds = array<i64: 1>, scalar_prefetch = 0 : i64, scratch_operands = 0 : i64, tpu.core_type = #tpu.core_type<tc>, window_params = [{transform_indices = @transform_0, window_bounds = array<i64: 16, 256>}, {transform_indices = @transform_1, window_bounds = array<i64: 16, 16>}, {pipeline_mode = #tpu.pipeline_mode<synchronous>, transform_indices = @transform_2, window_bounds = array<i64: 256, 128>}, {pipeline_mode = #tpu.pipeline_mode<synchronous>, transform_indices = @transform_3, window_bounds = array<i64: 1, 128>}, {pipeline_mode = #tpu.pipeline_mode<synchronous>, transform_indices = @transform_4, window_bounds = array<i64: 128, 128>}, {pipeline_mode = #tpu.pipeline_mode<synchronous>, transform_indices = @transform_5, window_bounds = array<i64: 1, 128>}, {pipeline_mode = #tpu.pipeline_mode<synchronous>, transform_indices = @transform_6, window_bounds = array<i64: 16, 128>}, {pipeline_mode = #tpu.pipeline_mode<synchronous>, transform_indices = @transform_7, window_bounds = array<i64: 1, 128>}, {pipeline_mode = #tpu.pipeline_mode<synchronous>, transform_indices = @transform_8, window_bounds = array<i64: 128, 128>}, {pipeline_mode = #tpu.pipeline_mode<synchronous>, transform_indices = @transform_9, window_bounds = array<i64: 1, 128>}, {pipeline_mode = #tpu.pipeline_mode<synchronous>, transform_indices = @transform_10, window_bounds = array<i64: 256, 128>}, {pipeline_mode = #tpu.pipeline_mode<synchronous>, transform_indices = @transform_11, window_bounds = array<i64: 1, 128>}, {pipeline_mode = #tpu.pipeline_mode<synchronous>, transform_indices = @transform_12, window_bounds = array<i64: 128, 128>}, {pipeline_mode = #tpu.pipeline_mode<synchronous>, transform_indices = @transform_13, window_bounds = array<i64: 1, 128>}, {transform_indices = @transform_14, window_bounds = array<i64: 16, 128>}]} {
    %c0 = arith.constant 0 : index
    %c0_0 = arith.constant 0 : index
    %0 = vector.load %arg1[%c0, %c0_0] : memref<16x256xf32, #tpu.memory_space<vmem>>, vector<16x256xf32>
    %1 = arith.truncf %0 : vector<16x256xf32> to vector<16x256xbf16>
    %c0_1 = arith.constant 0 : index
    %c0_2 = arith.constant 0 : index
    %2 = vector.load %arg3[%c0_1, %c0_2] : memref<256x128xbf16, #tpu.memory_space<vmem>>, vector<256x128xbf16>
    %cst = arith.constant dense<0.000000e+00> : vector<16x128xf32>
    %3 = tpu.matmul %1, %2, %cst {dimension_numbers = #tpu.dot_dimension_numbers<[1], [0], [0], [1], [0, 0, 1, 1], [], []>} : vector<16x256xbf16>, vector<256x128xbf16>, vector<16x128xf32> -> vector<16x128xf32>
    %c0_3 = arith.constant 0 : index
    %c0_4 = arith.constant 0 : index
    %4 = vector.load %arg4[%c0_3, %c0_4] : memref<1x128xf32, #tpu.memory_space<vmem>>, vector<1x128xf32>
    %5 = vector.broadcast %4 : vector<1x128xf32> to vector<16x128xf32>
    %6 = arith.addf %3, %5 : vector<16x128xf32>
    %cst_5 = arith.constant 0.000000e+00 : f32
    %7 = vector.broadcast %cst_5 : f32 to vector<16x128xf32>
    %8 = arith.maximumf %6, %7 : vector<16x128xf32>
    %9 = arith.truncf %8 : vector<16x128xf32> to vector<16x128xbf16>
    %c0_6 = arith.constant 0 : index
    %c0_7 = arith.constant 0 : index
    %10 = vector.load %arg5[%c0_6, %c0_7] : memref<128x128xbf16, #tpu.memory_space<vmem>>, vector<128x128xbf16>
    %cst_8 = arith.constant dense<0.000000e+00> : vector<16x128xf32>
    %11 = tpu.matmul %9, %10, %cst_8 {dimension_numbers = #tpu.dot_dimension_numbers<[1], [0], [0], [1], [0, 0, 1, 1], [], []>} : vector<16x128xbf16>, vector<128x128xbf16>, vector<16x128xf32> -> vector<16x128xf32>
    %c0_9 = arith.constant 0 : index
    %c0_10 = arith.constant 0 : index
    %12 = vector.load %arg6[%c0_9, %c0_10] : memref<1x128xf32, #tpu.memory_space<vmem>>, vector<1x128xf32>
    %13 = vector.broadcast %12 : vector<1x128xf32> to vector<16x128xf32>
    %14 = arith.addf %11, %13 : vector<16x128xf32>
    %cst_11 = arith.constant 0.000000e+00 : f32
    %15 = vector.broadcast %cst_11 : f32 to vector<16x128xf32>
    %16 = arith.maximumf %14, %15 : vector<16x128xf32>
    %c0_12 = arith.constant 0 : index
    %c0_13 = arith.constant 0 : index
    %17 = vector.load %arg2[%c0_12, %c0_13] : memref<16x16xf32, #tpu.memory_space<vmem>>, vector<16x16xf32>
    %18 = arith.truncf %17 : vector<16x16xf32> to vector<16x16xbf16>
    %c0_14 = arith.constant 0 : index
    %c0_15 = arith.constant 0 : index
    %19 = vector.load %arg7[%c0_14, %c0_15] : memref<16x128xbf16, #tpu.memory_space<vmem>>, vector<16x128xbf16>
    %cst_16 = arith.constant dense<0.000000e+00> : vector<16x128xf32>
    %20 = tpu.matmul %18, %19, %cst_16 {dimension_numbers = #tpu.dot_dimension_numbers<[1], [0], [0], [1], [0, 0, 1, 1], [], []>} : vector<16x16xbf16>, vector<16x128xbf16>, vector<16x128xf32> -> vector<16x128xf32>
    %c0_17 = arith.constant 0 : index
    %c0_18 = arith.constant 0 : index
    %21 = vector.load %arg8[%c0_17, %c0_18] : memref<1x128xf32, #tpu.memory_space<vmem>>, vector<1x128xf32>
    %22 = vector.broadcast %21 : vector<1x128xf32> to vector<16x128xf32>
    %23 = arith.addf %20, %22 : vector<16x128xf32>
    %cst_19 = arith.constant 0.000000e+00 : f32
    %24 = vector.broadcast %cst_19 : f32 to vector<16x128xf32>
    %25 = arith.maximumf %23, %24 : vector<16x128xf32>
    %26 = arith.truncf %25 : vector<16x128xf32> to vector<16x128xbf16>
    %c0_20 = arith.constant 0 : index
    %c0_21 = arith.constant 0 : index
    %27 = vector.load %arg9[%c0_20, %c0_21] : memref<128x128xbf16, #tpu.memory_space<vmem>>, vector<128x128xbf16>
    %cst_22 = arith.constant dense<0.000000e+00> : vector<16x128xf32>
    %28 = tpu.matmul %26, %27, %cst_22 {dimension_numbers = #tpu.dot_dimension_numbers<[1], [0], [0], [1], [0, 0, 1, 1], [], []>} : vector<16x128xbf16>, vector<128x128xbf16>, vector<16x128xf32> -> vector<16x128xf32>
    %c0_23 = arith.constant 0 : index
    %c0_24 = arith.constant 0 : index
    %29 = vector.load %arg10[%c0_23, %c0_24] : memref<1x128xf32, #tpu.memory_space<vmem>>, vector<1x128xf32>
    %30 = vector.broadcast %29 : vector<1x128xf32> to vector<16x128xf32>
    %31 = arith.addf %28, %30 : vector<16x128xf32>
    %cst_25 = arith.constant 0.000000e+00 : f32
    %32 = vector.broadcast %cst_25 : f32 to vector<16x128xf32>
    %33 = arith.maximumf %31, %32 : vector<16x128xf32>
    %34 = arith.truncf %16 : vector<16x128xf32> to vector<16x128xbf16>
    %35 = arith.truncf %33 : vector<16x128xf32> to vector<16x128xbf16>
    %36 = tpu.concatenate %34, %35 in 1 : vector<16x128xbf16>, vector<16x128xbf16> -> vector<16x256xbf16>
    %c0_26 = arith.constant 0 : index
    %c0_27 = arith.constant 0 : index
    %37 = vector.load %arg11[%c0_26, %c0_27] : memref<256x128xbf16, #tpu.memory_space<vmem>>, vector<256x128xbf16>
    %cst_28 = arith.constant dense<0.000000e+00> : vector<16x128xf32>
    %38 = tpu.matmul %36, %37, %cst_28 {dimension_numbers = #tpu.dot_dimension_numbers<[1], [0], [0], [1], [0, 0, 1, 1], [], []>} : vector<16x256xbf16>, vector<256x128xbf16>, vector<16x128xf32> -> vector<16x128xf32>
    %c0_29 = arith.constant 0 : index
    %c0_30 = arith.constant 0 : index
    %39 = vector.load %arg12[%c0_29, %c0_30] : memref<1x128xf32, #tpu.memory_space<vmem>>, vector<1x128xf32>
    %40 = vector.broadcast %39 : vector<1x128xf32> to vector<16x128xf32>
    %41 = arith.addf %38, %40 : vector<16x128xf32>
    %cst_31 = arith.constant 0.000000e+00 : f32
    %42 = vector.broadcast %cst_31 : f32 to vector<16x128xf32>
    %43 = arith.maximumf %41, %42 : vector<16x128xf32>
    %44 = arith.truncf %43 : vector<16x128xf32> to vector<16x128xbf16>
    %c0_32 = arith.constant 0 : index
    %c0_33 = arith.constant 0 : index
    %45 = vector.load %arg13[%c0_32, %c0_33] : memref<128x128xbf16, #tpu.memory_space<vmem>>, vector<128x128xbf16>
    %cst_34 = arith.constant dense<0.000000e+00> : vector<16x128xf32>
    %46 = tpu.matmul %44, %45, %cst_34 {dimension_numbers = #tpu.dot_dimension_numbers<[1], [0], [0], [1], [0, 0, 1, 1], [], []>} : vector<16x128xbf16>, vector<128x128xbf16>, vector<16x128xf32> -> vector<16x128xf32>
    %c0_35 = arith.constant 0 : index
    %c0_36 = arith.constant 0 : index
    %47 = vector.load %arg14[%c0_35, %c0_36] : memref<1x128xf32, #tpu.memory_space<vmem>>, vector<1x128xf32>
    %48 = vector.broadcast %47 : vector<1x128xf32> to vector<16x128xf32>
    %49 = arith.addf %46, %48 : vector<16x128xf32>
    %50 = tpu.iota {dimensions = array<i32: 1>} : vector<16x128xi32>
    %c0_i32 = arith.constant 0 : i32
    %51 = vector.broadcast %c0_i32 : i32 to vector<16x128xi32>
    %52 = arith.cmpi eq, %50, %51 : vector<16x128xi32>
    %53 = arith.negf %49 : vector<16x128xf32>
    %54 = math.exp %53 : vector<16x128xf32>
    %cst_37 = arith.constant 1.000000e+00 : f32
    %55 = vector.broadcast %cst_37 : f32 to vector<16x128xf32>
    %56 = arith.addf %55, %54 : vector<16x128xf32>
    %57 = arith.divf %55, %56 : vector<16x128xf32>
    %58 = arith.select %52, %57, %49 : vector<16x128xi1>, vector<16x128xf32>
    %59 = arith.truncf %58 : vector<16x128xf32> to vector<16x128xbf16>
    %c0_38 = arith.constant 0 : index
    %c0_39 = arith.constant 0 : index
    %60 = vector.load %arg15[%c0_38, %c0_39] : memref<16x128xbf16, #tpu.memory_space<vmem>>, vector<16x128xbf16>
    tpu.vector_store %arg15[%c0_38, %c0_39], %59 {strides = array<i32>} : memref<16x128xbf16, #tpu.memory_space<vmem>>, vector<16x128xbf16>,
    return
  }
  func.func @transform_0(%arg0: i32) -> (i32, i32) {
    %c0_i32 = arith.constant 0 : i32
    %c0_i32_0 = arith.constant 0 : i32
    return %arg0, %c0_i32 : i32, i32
  }
  func.func @transform_1(%arg0: i32) -> (i32, i32) {
    %c0_i32 = arith.constant 0 : i32
    %c0_i32_0 = arith.constant 0 : i32
    return %arg0, %c0_i32 : i32, i32
  }
  func.func @transform_2(%arg0: i32) -> (i32, i32) {
    %c0_i32 = arith.constant 0 : i32
    %c0_i32_0 = arith.constant 0 : i32
    %c0_i32_1 = arith.constant 0 : i32
    return %c0_i32, %c0_i32_0 : i32, i32
  }
  func.func @transform_3(%arg0: i32) -> (i32, i32) {
    %c0_i32 = arith.constant 0 : i32
    %c0_i32_0 = arith.constant 0 : i32
    %c0_i32_1 = arith.constant 0 : i32
    return %c0_i32, %c0_i32_0 : i32, i32
  }
  func.func @transform_4(%arg0: i32) -> (i32, i32) {
    %c0_i32 = arith.constant 0 : i32
    %c0_i32_0 = arith.constant 0 : i32
    %c0_i32_1 = arith.constant 0 : i32
    return %c0_i32, %c0_i32_0 : i32, i32
  }
  func.func @transform_5(%arg0: i32) -> (i32, i32) {
    %c0_i32 = arith.constant 0 : i32
    %c0_i32_0 = arith.constant 0 : i32
    %c0_i32_1 = arith.constant 0 : i32
    return %c0_i32, %c0_i32_0 : i32, i32
  }
  func.func @transform_6(%arg0: i32) -> (i32, i32) {
    %c0_i32 = arith.constant 0 : i32
    %c0_i32_0 = arith.constant 0 : i32
    %c0_i32_1 = arith.constant 0 : i32
    return %c0_i32, %c0_i32_0 : i32, i32
  }
  func.func @transform_7(%arg0: i32) -> (i32, i32) {
    %c0_i32 = arith.constant 0 : i32
    %c0_i32_0 = arith.constant 0 : i32
    %c0_i32_1 = arith.constant 0 : i32
    return %c0_i32, %c0_i32_0 : i32, i32
  }
  func.func @transform_8(%arg0: i32) -> (i32, i32) {
    %c0_i32 = arith.constant 0 : i32
    %c0_i32_0 = arith.constant 0 : i32
    %c0_i32_1 = arith.constant 0 : i32
    return %c0_i32, %c0_i32_0 : i32, i32
  }
  func.func @transform_9(%arg0: i32) -> (i32, i32) {
    %c0_i32 = arith.constant 0 : i32
    %c0_i32_0 = arith.constant 0 : i32
    %c0_i32_1 = arith.constant 0 : i32
    return %c0_i32, %c0_i32_0 : i32, i32
  }
  func.func @transform_10(%arg0: i32) -> (i32, i32) {
    %c0_i32 = arith.constant 0 : i32
    %c0_i32_0 = arith.constant 0 : i32
    %c0_i32_1 = arith.constant 0 : i32
    return %c0_i32, %c0_i32_0 : i32, i32
  }
  func.func @transform_11(%arg0: i32) -> (i32, i32) {
    %c0_i32 = arith.constant 0 : i32
    %c0_i32_0 = arith.constant 0 : i32
    %c0_i32_1 = arith.constant 0 : i32
    return %c0_i32, %c0_i32_0 : i32, i32
  }
  func.func @transform_12(%arg0: i32) -> (i32, i32) {
    %c0_i32 = arith.constant 0 : i32
    %c0_i32_0 = arith.constant 0 : i32
    %c0_i32_1 = arith.constant 0 : i32
    return %c0_i32, %c0_i32_0 : i32, i32
  }
  func.func @transform_13(%arg0: i32) -> (i32, i32) {
    %c0_i32 = arith.constant 0 : i32
    %c0_i32_0 = arith.constant 0 : i32
    %c0_i32_1 = arith.constant 0 : i32
    return %c0_i32, %c0_i32_0 : i32, i32
  }
  func.func @transform_14(%arg0: i32) -> (i32, i32) {
    %c0_i32 = arith.constant 0 : i32
    %c0_i32_0 = arith.constant 0 : i32
    return %arg0, %c0_i32 : i32, i32
  }
}

</mosaic_0001>

<bundles_post_ra>
// kernel: _forward_impl.1
= control target key start
LH: loop header
LB: loop body
LE: loop exit
PB: predicated region body
PF: predicated region fallthrough
CT: control target
= control target key end

     0   :  { %v1169_v2 = vmov 0.0   ;;  %vm1170_vm0 = vmmov 0   ;;  %vm365_vm1 = vcmask 130048   ;;  %s1489_s0 = inlined_call_operand.vmem [shape: f32[8,256], index: 0, kind: input, shape index: {}]   ;;  %s1490_s1 = inlined_call_operand.vmem [shape: f32[8,16], index: 1, kind: input, shape index: {}]   ;;  %s1491_s2 = inlined_call_operand.vmem [shape: bf16[256,128], index: 2, kind: input, shape index: {}]   ;;  %s1492_s3 = inlined_call_operand.vmem [shape: f32[1,128], index: 3, kind: input, shape index: {}]   ;;  %s1493_s4 = inlined_call_operand.vmem [shape: bf16[128,128], index: 4, kind: input, shape index: {}]   ;;  %s1494_s5 = inlined_call_operand.vmem [shape: f32[1,128], index: 5, kind: input, shape index: {}]   ;;  %s1495_s6 = inlined_call_operand.vmem [shape: bf16[16,128], index: 6, kind: input, shape index: {}]   ;;  %s1496_s7 = inlined_call_operand.vmem [shape: f32[1,128], index: 7, kind: input, shape index: {}]   ;;  %s1497_s8 = inlined_call_operand.vmem [shape: bf16[128,128], index: 8, kind: input, shape index: {}]   ;;  %s1498_s9 = inlined_call_operand.vmem [shape: f32[1,128], index: 9, kind: input, shape index: {}]   ;;  %s1499_s10 = inlined_call_operand.vmem [shape: bf16[256,128], index: 10, kind: input, shape index: {}]   ;;  %s1500_s11 = inlined_call_operand.vmem [shape: f32[1,128], index: 11, kind: input, shape index: {}]   ;;  %s1501_s12 = inlined_call_operand.vmem [shape: bf16[128,128], index: 12, kind: input, shape index: {}]   ;;  %s1502_s13 = inlined_call_operand.vmem [shape: f32[1,128], index: 13, kind: input, shape index: {}]   ;;  %s1503_s14 = inlined_call_operand.vmem [shape: bf16[8,128], index: 14, kind: output, shape index: {}]  }
   0x1   :  { %v1104_v0 = vld [vmem:[%s1491_s2 + $0x78] sm:$0xff]   ;;  %1036 = vmatprep.subr.bf16.mxu1 %v1169_v2  ;;  %v1106_v3 = vld [vmem:[%s1491_s2 + $0x70] sm:$0xff]   ;;  %1052 = vmatprep.mubr.msk.bf16.mxu1 %vm1170_vm0, %v1169_v2  ;;  %v1108_v5 = vld [vmem:[%s1491_s2 + $0x68] sm:$0xff]  }
   0x2   :  { %v1105_v1 = vld [vmem:[%s1491_s2 + $0x38] sm:$0xff]   ;;  %963 = vmatprep.subr.bf16.mxu0 %v1104_v0  ;;  %v1107_v4 = vld [vmem:[%s1491_s2 + $0x30] sm:$0xff]   ;;  %v1109_v6 = vld [vmem:[%s1491_s2 + $0x28] sm:$0xff]  }
   0x3   :  { %964 = vmatpush3.bf16.msra.mxu0 %v1105_v1  ;;  %v1110_v7 = vld [vmem:[%s1491_s2 + $0x60] sm:$0xff]   ;;  %v1112_v9 = vld [vmem:[%s1491_s2 + $0x58] sm:$0xff]   ;;  %v1114_v11 = vld [vmem:[%s1491_s2 + $0x50] sm:$0xff]  }
   0x4   :  { %965 = vmatprep.subr.bf16.mxu0 %v1106_v3  ;;  %v1111_v8 = vld [vmem:[%s1491_s2 + $0x20] sm:$0xff]   ;;  %v1113_v10 = vld [vmem:[%s1491_s2 + $0x18] sm:$0xff]   ;;  %v49_v12 = vld [vmem:[%s1489_s0 + $0x8] sm:$0xff] }
   0x5   :  { %v51_v13 = vld [vmem:[%s1489_s0 + $0x18] sm:$0xff]  ;;  %v1115_v15 = vld [vmem:[%s1491_s2 + $0x10] sm:$0xff]   ;;  %v1116_v17 = vld [vmem:[%s1491_s2 + $0x48] sm:$0xff]  }
   0x6   :  { %v53_v14 = vpack.c.bf16 %v51_v13, %v49_v12  ;;  %v1121_v16 = vld [vmem:[%s1493_s4 + $0x38] sm:$0xff]   ;;  %v1117_v18 = vld [vmem:[%s1491_s2 + $0x8] sm:$0xff]   ;;  %v1122_v19 = vld [vmem:[%s1493_s4 + $0x30] sm:$0xff]  }
   0x7   :  { %966 = vmatpush3.bf16.msra.mxu0 %v1107_v4  ;;  %1037 = vmatpush3.bf16.msra.mxu1 %v1121_v16  ;;  %v1118_v20 = vld [vmem:[%s1491_s2 + $0x40] sm:$0xff]   ;;  %v1123_v21 = vld [vmem:[%s1493_s4 + $0x28] sm:$0xff]   ;;  %v50_v24 = vld [vmem:[%s1489_s0 + $0x10] sm:$0xff] }
   0x8   :  { %967 = vmatprep.subr.bf16.mxu0 %v1108_v5  ;;  %221 = vmatprep.mubr.bf16.mxu0 %v53_v14  ;;  %v1119_v22 = vld [vmem:[%s1491_s2] sm:$0xff]   ;;  %v1125_v28 = vld [vmem:[%s1493_s4 + $0x18] sm:$0xff]   ;;  %v348_v30 = vld [vmem:[%s1490_s1 + $0x8] sm:$0xff] }
   0x9   :  { %1038 = vmatprep.subr.bf16.mxu1 %v1169_v2  ;;  %v48_v23 = vld [vmem:[%s1489_s0] sm:$0xff]  ;;  %v1126_v32 = vld [vmem:[%s1493_s4 + $0x10] sm:$0xff]   ;;  %v1127_v33 = vld [vmem:[%s1493_s4 + $0x8] sm:$0xff]  }
   0xa   :  { %v1124_v25 = vld [vmem:[%s1493_s4 + $0x20] sm:$0xff]   ;;  %v52_v27 = vpack.c.bf16 %v50_v24, %v48_v23  ;;  %v1129_v48 = vld [vmem:[%s1497_s8 + $0x38] sm:$0xff]   ;;  %v1130_v52 = vld [vmem:[%s1497_s8 + $0x30] sm:$0xff]  }
   0xb   :  { %968 = vmatpush3.bf16.msra.mxu0 %v1109_v6  ;;  %1039 = vmatpush3.bf16.msra.mxu1 %v1122_v19  ;;  %v1120_v26 = vld [vmem:[%s1495_s6] sm:$0xff]   ;;  %v1131_v53 = vld [vmem:[%s1497_s8 + $0x28] sm:$0xff]   ;;  %v1133_v55 = vld [vmem:[%s1497_s8 + $0x18] sm:$0xff]  }
   0xc   :  { %969 = vmatprep.subr.bf16.mxu0 %v1110_v7  ;;  %1040 = vmatprep.subr.bf16.mxu1 %v1169_v2  ;;  %v347_v29 = vld [vmem:[%s1490_s1] sm:$0xff]  ;;  %v1134_v56 = vld [vmem:[%s1497_s8 + $0x10] sm:$0xff]   ;;  %v1135_v58 = vld [vmem:[%s1497_s8 + $0x8] sm:$0xff]  }
   0xd   :  { %v349_v31 = vpack.c.bf16 %v348_v30, %v347_v29  ;;  %v1128_v34 = vld [vmem:[%s1493_s4] sm:$0xff]   ;;  %v1137_v1 = vld [vmem:[%s1499_s10 + $0x78] sm:$0xff]   ;;  %v1139_v4 = vld [vmem:[%s1499_s10 + $0x70] sm:$0xff]  }
   0xe   :  { %v888_v38 = vld [vmem:[%s1492_s3] ss:$0 sm:$0xff]  ;;  %v1138_v3 = vld [vmem:[%s1499_s10 + $0x38] sm:$0xff]   ;;  %v1140_v5 = vld [vmem:[%s1499_s10 + $0x30] sm:$0xff]  }
   0xf   :  { %970 = vmatpush3.bf16.msra.mxu0 %v1111_v8  ;;  %1041 = vmatpush3.bf16.msra.mxu1 %v1123_v21  ;;  %v1132_v54 = vld [vmem:[%s1497_s8 + $0x20] sm:$0xff]   ;;  %v1141_v6 = vld [vmem:[%s1499_s10 + $0x68] sm:$0xff]   ;;  %v1147_v12 = vld [vmem:[%s1499_s10 + $0x50] sm:$0xff]  }
  0x10   :  { %971 = vmatprep.subr.bf16.mxu0 %v1112_v9  ;;  %1042 = vmatprep.subr.bf16.mxu1 %v1169_v2  ;;  %v914_v57 = vld [vmem:[%s1496_s7] ss:$0 sm:$0xff]  ;;  %v1142_v7 = vld [vmem:[%s1499_s10 + $0x28] sm:$0xff]   ;;  %v1148_v13 = vld [vmem:[%s1499_s10 + $0x10] sm:$0xff]  }
  0x11   :  { %v1136_v61 = vld [vmem:[%s1497_s8] sm:$0xff]   ;;  %v1149_v14 = vld [vmem:[%s1499_s10 + $0x48] sm:$0xff]   ;;  %v1154_v19 = vld [vmem:[%s1501_s12 + $0x30] sm:$0xff]  }
  0x12   :  { %v1143_v8 = vld [vmem:[%s1499_s10 + $0x60] sm:$0xff]  }
  0x13   :  { %972 = vmatpush3.bf16.msra.mxu0 %v1113_v10  ;;  %1043 = vmatpush3.bf16.msra.mxu1 %v1124_v25  ;;  %v1144_v9 = vld [vmem:[%s1499_s10 + $0x20] sm:$0xff]   ;;  %v1145_v10 = vld [vmem:[%s1499_s10 + $0x58] sm:$0xff]  }
  0x14   :  { %973 = vmatprep.subr.bf16.mxu0 %v1114_v11  ;;  %1044 = vmatprep.subr.bf16.mxu1 %v1169_v2  ;;  %v1146_v11 = vld [vmem:[%s1499_s10 + $0x18] sm:$0xff]   ;;  %v1151_v16 = vld [vmem:[%s1499_s10 + $0x40] sm:$0xff]  }
  0x15   :  { %v1156_v21 = vld [vmem:[%s1501_s12 + $0x20] sm:$0xff]  }
  0x17   :  { %974 = vmatpush3.bf16.msra.mxu0 %v1115_v15  ;;  %1045 = vmatpush3.bf16.msra.mxu1 %v1125_v28  ;;  %v1150_v15 = vld [vmem:[%s1499_s10 + $0x8] sm:$0xff]   ;;  %v905_v28 = vld [vmem:[%s1494_s5] ss:$0 sm:$0xff] }
  0x18   :  { %975 = vmatprep.subr.bf16.mxu0 %v1116_v17  ;;  %1046 = vmatprep.subr.bf16.mxu1 %v1169_v2  ;;  %v1152_v17 = vld [vmem:[%s1499_s10] sm:$0xff]  }
  0x1b   :  { %976 = vmatpush3.bf16.msra.mxu0 %v1117_v18  ;;  %1047 = vmatpush3.bf16.msra.mxu1 %v1126_v32  ;;  %v1153_v18 = vld [vmem:[%s1501_s12 + $0x38] sm:$0xff]  }
  0x1c   :  { %977 = vmatprep.subr.bf16.mxu0 %v1118_v20  ;;  %1048 = vmatprep.subr.bf16.mxu1 %v1169_v2  ;;  %v1155_v20 = vld [vmem:[%s1501_s12 + $0x28] sm:$0xff]  }
  0x1f   :  { %978 = vmatpush3.bf16.msra.mxu0 %v1119_v22  ;;  %1049 = vmatpush3.bf16.msra.mxu1 %v1127_v33 }
  0x20   :  { %1056 = vmatprep.subr.bf16.mxu0 %v1169_v2  ;;  %1050 = vmatprep.subr.bf16.mxu1 %v1169_v2 }
  0x22   :  { %222 = vmatmul.mubr.bf16.vlgmr.msra.gmra.mxu0 %v52_v27 }
  0x23   :  { %1057 = vmatpush3.bf16.msra.mxu0 %v1120_v26  ;;  %1058 = vmatprep.mubr.msk.bf16.mxu0 %vm1170_vm0, %v1169_v2  ;;  %v917_v26 = vld [vmem:[%s1498_s9] ss:$0 sm:$0xff] }
  0x24   :  { %1051 = vmatpush3.bf16.msra.mxu1 %v1128_v34  ;;  %1005 = vmatprep.subr.bf16.mxu0 %v1137_v1 }
  0x25   :  { %1062 = vmatprep.subr.bf16.mxu1 %v1169_v2 }
  0x2a   :  { %1059 = vmatmul.mubr.msk.bf16.vlgmr.msra.gmra.mxu0 %vm365_vm1, %v349_v31 }
  0x2b   :  { %1006 = vmatpush3.bf16.msra.mxu0 %v1138_v3 }
  0x2c   :  { %1007 = vmatprep.subr.bf16.mxu0 %v1139_v4 }
  0x2f   :  { %1008 = vmatpush3.bf16.msra.mxu0 %v1140_v5 }
  0x30   :  { %1009 = vmatprep.subr.bf16.mxu0 %v1141_v6 }
  0x33   :  { %1010 = vmatpush3.bf16.msra.mxu0 %v1142_v7  ;;  %v820_v7 = vlaneseq }
  0x34   :  { %1011 = vmatprep.subr.bf16.mxu0 %v1143_v8 }
  0x35   :  { %v821_v8 = vand.u32 127, %v820_v7 }
  0x37   :  { %1012 = vmatpush3.bf16.msra.mxu0 %v1144_v9  ;;  %vm822_vm2 = vcmp.eq.s32.totalorder %v821_v8, 0 }
  0x38   :  { %1013 = vmatprep.subr.bf16.mxu0 %v1145_v10 }
  0x3b   :  { %1014 = vmatpush3.bf16.msra.mxu0 %v1146_v11 }
  0x3c   :  { %1015 = vmatprep.subr.bf16.mxu0 %v1147_v12 }
  0x3f   :  { %1016 = vmatpush3.bf16.msra.mxu0 %v1148_v13 }
  0x40   :  { %1017 = vmatprep.subr.bf16.mxu0 %v1149_v14 }
  0x43   :  { %1018 = vmatpush3.bf16.msra.mxu0 %v1150_v15 }
  0x44   :  { %1019 = vmatprep.subr.bf16.mxu0 %v1151_v16 }
  0x47   :  { %1020 = vmatpush3.bf16.msra.mxu0 %v1152_v17 }
  0xe2   :  { %v979_v35 = vpop.f32.mrf.mxu0 }
  0xe4   :  { %v980_v36 = vpop.f32.mrf.mxu0 }
  0xe5   :  { %v981_v37 = vadd.f32 %v980_v36, %v979_v35 }
  0xe6   :  { %v982_v39 = vpop.f32.mrf.mxu0 }
  0xe7   :  { %v224_v41 = vadd.f32 %v981_v37, %v888_v38 }
  0xe8   :  { %v983_v40 = vpop.f32.mrf.mxu0 }
  0xe9   :  { %v984_v42 = vadd.f32 %v983_v40, %v982_v39  ;;  %v230_v46 = vmax.f32 %v224_v41, 0.0 }
  0xea   :  { %v403_v43 = vpop.f32.mrf.mxu0 }
  0xeb   :  { %v227_v44 = vadd.f32 %v984_v42, %v888_v38  ;;  %v404_v59 = vadd.f32 %v914_v57, %v403_v43  ;;  %v1157_v42 = vld [vmem:[%s1501_s12 + $0x18] sm:$0xff]   ;;  %v1158_v43 = vld [vmem:[%s1501_s12 + $0x10] sm:$0xff]  }
  0xec   :  { %v1060_v45 = vpop.f32.mrf.mxu0 }
  0xed   :  { %v231_v47 = vmax.f32 %v227_v44, 0.0  ;;  %v410_v62 = vmax.f32 %v404_v59, 0.0  ;;  %v1159_v44 = vld [vmem:[%s1501_s12 + $0x8] sm:$0xff]   ;;  %v1160_v45 = vld [vmem:[%s1501_s12] sm:$0xff]  }
  0xee   :  { %v406_v49 = vpop.f32.mrf.mxu0 }
  0xef   :  { %v232_v50 = vpack.c.bf16 %v231_v47, %v230_v46  ;;  %v407_v60 = vadd.f32 %v914_v57, %v406_v49  ;;  %v926_v49 = vld [vmem:[%s1500_s11] ss:$0 sm:$0xff] }
  0xf0   :  { %v1061_v51 = vpop.f32.mrf.mxu0  ;;  %v943_v57 = vld [vmem:[%s1502_s13] ss:$0 sm:$0xff] }
  0xf1   :  { %1053 = vmatmul.mubr.bf16.vlgmr.msra.gmra.mxu1 %v232_v50  ;;  %v411_v63 = vmax.f32 %v407_v60, 0.0 }
  0xf2   :  { %1063 = vmatpush3.bf16.msra.mxu1 %v1129_v48  ;;  %1078 = vmatprep.mubr.msk.bf16.mxu1 %vm1170_vm0, %v1169_v2 }
  0xf3   :  { %1064 = vmatprep.subr.bf16.mxu1 %v1169_v2  ;;  %v412_v0 = vpack.c.bf16 %v411_v63, %v410_v62 }
  0xf6   :  { %1065 = vmatpush3.bf16.msra.mxu1 %v1130_v52 }
  0xf7   :  { %1066 = vmatprep.subr.bf16.mxu1 %v1169_v2 }
  0xfa   :  { %1067 = vmatpush3.bf16.msra.mxu1 %v1131_v53 }
  0xfb   :  { %1068 = vmatprep.subr.bf16.mxu1 %v1169_v2 }
  0xfe   :  { %1069 = vmatpush3.bf16.msra.mxu1 %v1132_v54 }
  0xff   :  { %1070 = vmatprep.subr.bf16.mxu1 %v1169_v2 }
 0x102   :  { %1071 = vmatpush3.bf16.msra.mxu1 %v1133_v55 }
 0x103   :  { %1072 = vmatprep.subr.bf16.mxu1 %v1169_v2 }
 0x106   :  { %1073 = vmatpush3.bf16.msra.mxu1 %v1134_v56 }
 0x107   :  { %1074 = vmatprep.subr.bf16.mxu1 %v1169_v2 }
 0x10a   :  { %1075 = vmatpush3.bf16.msra.mxu1 %v1135_v58 }
 0x10b   :  { %1076 = vmatprep.subr.bf16.mxu1 %v1169_v2 }
 0x10e   :  { %1077 = vmatpush3.bf16.msra.mxu1 %v1136_v61 }
 0x10f   :  { %1082 = vmatprep.subr.bf16.mxu1 %v1169_v2 }
 0x111   :  { %1079 = vmatmul.mubr.bf16.vlgmr.msra.gmra.mxu1 %v412_v0 }
 0x112   :  { %1098 = vmatprep.mubr.msk.bf16.mxu1 %vm1170_vm0, %v1169_v2  ;;  %1083 = vmatpush3.bf16.msra.mxu1 %v1153_v18 }
 0x113   :  { %1084 = vmatprep.subr.bf16.mxu1 %v1169_v2 }
 0x116   :  { %1085 = vmatpush3.bf16.msra.mxu1 %v1154_v19 }
 0x117   :  { %1086 = vmatprep.subr.bf16.mxu1 %v1169_v2 }
 0x11a   :  { %1087 = vmatpush3.bf16.msra.mxu1 %v1155_v20 }
 0x11b   :  { %1088 = vmatprep.subr.bf16.mxu1 %v1169_v2 }
 0x11e   :  { %1089 = vmatpush3.bf16.msra.mxu1 %v1156_v21 }
 0x11f   :  { %1090 = vmatprep.subr.bf16.mxu1 %v1169_v2 }
 0x122   :  { %1091 = vmatpush3.bf16.msra.mxu1 %v1157_v42 }
 0x123   :  { %1092 = vmatprep.subr.bf16.mxu1 %v1169_v2 }
 0x126   :  { %1093 = vmatpush3.bf16.msra.mxu1 %v1158_v43 }
 0x127   :  { %1094 = vmatprep.subr.bf16.mxu1 %v1169_v2 }
 0x12a   :  { %1095 = vmatpush3.bf16.msra.mxu1 %v1159_v44 }
 0x12b   :  { %1096 = vmatprep.subr.bf16.mxu1 %v1169_v2 }
 0x12e   :  { %1097 = vmatpush3.bf16.msra.mxu1 %v1160_v45 }
 0x1b1   :  { %v338_v22 = vpop.f32.mrf.mxu1 }
 0x1b2   :  { %v339_v32 = vadd.f32 %v905_v28, %v338_v22 }
 0x1b3   :  { %v1054_v23 = vpop.f32.mrf.mxu1 }
 0x1b4   :  { %v345_v39 = vmax.f32 %v339_v32, 0.0 }
 0x1b5   :  { %v341_v24 = vpop.f32.mrf.mxu1 }
 0x1b6   :  { %v342_v29 = vadd.f32 %v905_v28, %v341_v24 }
 0x1b7   :  { %v1055_v25 = vpop.f32.mrf.mxu1 }
 0x1b8   :  { %v346_v35 = vmax.f32 %v342_v29, 0.0 }
 0x1ba   :  { %v527_v41 = vpack.c.bf16 %v346_v35, %v345_v39 }
 0x1d1   :  { %v518_v27 = vpop.f32.mrf.mxu1 }
 0x1d2   :  { %v519_v31 = vadd.f32 %v917_v26, %v518_v27 }
 0x1d3   :  { %v1080_v30 = vpop.f32.mrf.mxu1 }
 0x1d4   :  { %v525_v37 = vmax.f32 %v519_v31, 0.0 }
 0x1d5   :  { %v521_v33 = vpop.f32.mrf.mxu1 }
 0x1d6   :  { %v522_v34 = vadd.f32 %v917_v26, %v521_v33 }
 0x1d7   :  { %v1081_v36 = vpop.f32.mrf.mxu1 }
 0x1d8   :  { %v526_v38 = vmax.f32 %v522_v34, 0.0 }
 0x1da   :  { %v528_v40 = vpack.c.bf16 %v526_v38, %v525_v37 }
 0x1dc   :  { %696 = vmatprep.mubr.bf16.mxu0 %v528_v40 }
 0x1dd   :  { %697 = vmatmul.mubr.bf16.vlgmr.msra.gmra.mxu0 %v527_v41 }
 0x29d   :  { %v1021_v46 = vpop.f32.mrf.mxu0 }
 0x29f   :  { %v1022_v47 = vpop.f32.mrf.mxu0 }
 0x2a0   :  { %v1023_v48 = vadd.f32 %v1022_v47, %v1021_v46 }
 0x2a1   :  { %v1024_v50 = vpop.f32.mrf.mxu0 }
 0x2a2   :  { %v699_v52 = vadd.f32 %v1023_v48, %v926_v49 }
 0x2a3   :  { %v1025_v51 = vpop.f32.mrf.mxu0 }
 0x2a4   :  { %v1026_v53 = vadd.f32 %v1025_v51, %v1024_v50  ;;  %v705_v55 = vmax.f32 %v699_v52, 0.0 }
 0x2a6   :  { %v702_v54 = vadd.f32 %v1026_v53, %v926_v49 }
 0x2a8   :  { %v706_v56 = vmax.f32 %v702_v54, 0.0 }
 0x2aa   :  { %v707_v2 = vpack.c.bf16 %v706_v56, %v705_v55 }
 0x2ac   :  { %1099 = vmatmul.mubr.bf16.vlgmr.msra.gmra.mxu1 %v707_v2 }
 0x36c   :  { %v813_v58 = vpop.f32.mrf.mxu1 }
 0x36d   :  { %v814_v59 = vadd.f32 %v943_v57, %v813_v58 }
 0x36e   :  { %v1100_v60 = vpop.f32.mrf.mxu1 }
 0x36f   :  { %v952_v61 = vmul.f32 -1.442695, %v814_v59 }
 0x370   :  { %v816_v62 = vpop.f32.mrf.mxu1 }
 0x371   :  { %1161 = vpow2.f32 %v952_v61  ;;  %v817_v63 = vadd.f32 %v943_v57, %v816_v62 }
 0x372   :  { %v1101_v0 = vpop.f32.mrf.mxu1 }
 0x373   :  { %v953_v1 = vmul.f32 -1.442695, %v817_v63 }
 0x375   :  { %1163 = vpow2.f32 %v953_v1 }
 0x37e   :  { %v1162_v3 = vpop.eup %1161 }
 0x37f   :  { %v829_v4 = vadd.f32 1.0, %v1162_v3 }
 0x381   :  { %1165 = vrcp.f32 %v829_v4 }
 0x382   :  { %v1164_v5 = vpop.eup %1163 }
 0x383   :  { %v830_v6 = vadd.f32 1.0, %v1164_v5 }
 0x385   :  { %1167 = vrcp.f32 %v830_v6 }
 0x38e   :  { %v1166_v9 = vpop.eup %1165 }
 0x38f   :  { %v835_v11 = vsel %vm822_vm2, %v1166_v9, %v814_v59 }
 0x392   :  { %v1168_v10 = vpop.eup %1167 }
 0x393   :  { %v836_v12 = vsel %vm822_vm2, %v1168_v10, %v817_v63 }
 0x394   :  { %v961_v13 = vpack.c.bf16 %v836_v12, %v835_v11 }
 0x396   :  { %962 = vst [vmem:[#allocation2] sm:$0xff] %v961_v13  }
 0x39d   :  { %v865_v14 = vld [vmem:[#allocation2] sm:$0xf] }
 0x39e   :  { %866 = vst [vmem:[%s1503_s14] sm:$0xf] %v865_v14 }

</bundles_post_ra>
